<compile_context>
chip_gen: v7x
topology: tpu7x:2x2x1
jax: 0.10.0
libtpu: 0.0.40
codegen_flags: <defaults>
</compile_context>

<pallas_src>
import jax
import jax.numpy as jnp
from jax.experimental import pallas as pl
from jax.experimental.pallas import tpu as pltpu

_LANE = 128
_SUBLANE = 8
_MIB = 1024 * 1024


def _round_up(n, m):
    return ((n + m - 1) // m) * m


# ----------------------------------------------------------------------------
# Kernel
# ----------------------------------------------------------------------------
def proxy_nn_kernel(x_ref, w1_ref, b1_ref, w2_ref, b2_ref, w3_ref, b3_ref, o_ref):
    # bf16 inputs on the MXU, f32 accumulation throughout.
    x_bf = x_ref[...].astype(jnp.bfloat16)

    # fc1 + tanh
    h1 = jnp.tanh(
        jnp.dot(x_bf, w1_ref[...], preferred_element_type=jnp.float32) + b1_ref[...]
    )
    # TODO(synk): on v6e/v7x compute tanh in bf16 (bf16 EUP ~2x); kept f32 for v5e portability.

    # fc2 + tanh
    # TODO(synk): for very large hidden_dim add a trailing 'arbitrary' K-tiling grid
    # axis over hid_p with an f32 VMEM accumulator so resident w2 fits v7x's 64 MiB VMEM
    # (bf16 weights already double the ceiling vs the previous f32 version).
    h2 = jnp.tanh(
        jnp.dot(h1.astype(jnp.bfloat16), w2_ref[...], preferred_element_type=jnp.float32)
        + b2_ref[...]
    )

    # fc3 (no activation)
    o_ref[...] = (
        jnp.dot(h2.astype(jnp.bfloat16), w3_ref[...], preferred_element_type=jnp.float32)
        + b3_ref[...]
    ).astype(o_ref.dtype)


# ----------------------------------------------------------------------------
# One-time parameter preparation (hoisted out of the per-call hot path)
# ----------------------------------------------------------------------------
def prepare_params(params, *, lane_dense_output=None):
    """Pad feature dims to 128 lanes, cast weights to bf16. Do this ONCE.

    Padding is exact: tanh(0)=0 and zero weight rows/cols contribute nothing.
    If lane_dense_output is None, the output store is lane-dense (padded to 128)
    only in the MXU-bound regime (large hidden); otherwise the narrow out_dim-wide
    store avoids 128x output HBM writeback inflation.
    """
    w1, b1, w2, b2, w3, b3 = (
        params["w1"], params["b1"], params["w2"],
        params["b2"], params["w3"], params["b3"],
    )
    in_dim, hid = w1.shape
    h2d = w2.shape[1]
    out_dim = w3.shape[1]

    hid_p = _round_up(hid, _LANE)
    h2_p = _round_up(h2d, _LANE)

    if lane_dense_output is None:
        lane_dense_output = hid_p >= 512  # MXU-bound heuristic
    out_cols = _round_up(out_dim, _LANE) if lane_dense_output else out_dim

    return {
        # x's K dim (in_dim) is NOT padded; MXU handles K < 128 internally.
        "w1": jnp.pad(w1, ((0, 0), (0, hid_p - hid))).astype(jnp.bfloat16),
        "b1": jnp.pad(b1, ((0, 0), (0, hid_p - hid))).astype(jnp.float32),
        "w2": jnp.pad(w2, ((0, hid_p - hid), (0, h2_p - h2d))).astype(jnp.bfloat16),
        "b2": jnp.pad(b2, ((0, 0), (0, h2_p - h2d))).astype(jnp.float32),
        "w3": jnp.pad(w3, ((0, h2_p - h2d), (0, out_cols - out_dim))).astype(jnp.bfloat16),
        "b3": jnp.pad(b3, ((0, 0), (0, out_cols - out_dim))).astype(jnp.float32),
        "in_dim": in_dim,
        "hid_p": hid_p,
        "h2_p": h2_p,
        "out_dim": out_dim,
        "out_cols": out_cols,
    }


# ----------------------------------------------------------------------------
# VMEM budgeting / tile sizing (generation-aware)
# ----------------------------------------------------------------------------
def _vmem_capacity_bytes():
    try:
        return int(pltpu.get_tpu_info().vmem_capacity_bytes)
    except Exception:
        return 64 * _MIB  # conservative: v7x per-TC physical VMEM


def _resident_bytes(in_dim, hid_p, h2_p, out_cols):
    # Single-buffered (pl.Buffered(1)) bf16 weights + f32 biases.
    return 2 * (in_dim * hid_p + hid_p * h2_p + h2_p * out_cols) + 4 * (hid_p + h2_p + out_cols)


def _per_row_bytes(in_dim, hid_p, h2_p, out_cols):
    # Double-buffered f32 x/out tiles + f32 and bf16 copies of h1/h2 temporaries.
    return 4 * 2 * in_dim + 4 * 2 * out_cols + 6 * (hid_p + h2_p)


def _choose_tile_b(batch, per_row, resident, vmem_cap):
    b_full = _round_up(batch, _SUBLANE)
    avail = max(vmem_cap - resident - 2 * _MIB, _SUBLANE * per_row)
    tile = (int(avail // per_row) // _SUBLANE) * _SUBLANE
    tile = max(tile, _SUBLANE)
    tile = min(tile, 2048)          # diminishing returns beyond ~1-2k rows/step
    tile = max(tile, 256)           # amortize ~0.35us/step pipeline overhead
    tile = min(tile, b_full)
    # Guarantee >=2 grid steps when the batch can be split: keeps both v7x
    # TensorCores busy under dimension_semantics=("parallel",).
    if b_full > _SUBLANE and pl.cdiv(b_full, tile) < 2:
        tile = _round_up(pl.cdiv(b_full, 2), _SUBLANE)
    return int(tile)


# ----------------------------------------------------------------------------
# Forward
# ----------------------------------------------------------------------------
def proxy_nn_forward(x, prepared, *, tile_b=None):
    """x: (B, input_dim) f32. prepared: output of prepare_params()."""
    B, in_dim = x.shape
    assert in_dim == prepared["in_dim"], (in_dim, prepared["in_dim"])
    hid_p, h2_p = prepared["hid_p"], prepared["h2_p"]
    out_dim, out_cols = prepared["out_dim"], prepared["out_cols"]

    capacity = _vmem_capacity_bytes()
    cap = int(capacity * 0.8)  # ~102 MiB on v5e/v6e (128 MiB), ~51 MiB on v7x (64 MiB)

    resident = _resident_bytes(in_dim, hid_p, h2_p, out_cols)
    per_row = _per_row_bytes(in_dim, hid_p, h2_p, out_cols)

    if tile_b is None:
        tile_b = _choose_tile_b(B, per_row, resident, cap)
    else:
        tile_b = max(_SUBLANE, _round_up(min(tile_b, _round_up(B, _SUBLANE)), _SUBLANE))

    B_pad = _round_up(B, tile_b)
    xp = jnp.pad(x, ((0, B_pad - B), (0, 0)))
    grid = (B_pad // tile_b,)

    footprint = resident + tile_b * per_row + 2 * _MIB
    vmem_limit = min(cap, max(int(1.3 * footprint), 16 * _MIB))
    vmem_limit = max(vmem_limit, footprint)   # never clamp below the true footprint
    vmem_limit = min(vmem_limit, capacity)

    # Constant-index_map operands: a single resident VMEM copy (no double buffer).
    weight_mode = pl.Buffered(1)

    out_padded = pl.pallas_call(
        proxy_nn_kernel,
        out_shape=jax.ShapeDtypeStruct((B_pad, out_cols), jnp.float32),
        grid=grid,
        in_specs=[
            pl.BlockSpec((tile_b, in_dim), lambda i: (i, 0)),                             # x (tiled)
            pl.BlockSpec((in_dim, hid_p), lambda i: (0, 0), pipeline_mode=weight_mode),   # w1
            pl.BlockSpec((1, hid_p), lambda i: (0, 0), pipeline_mode=weight_mode),        # b1
            pl.BlockSpec((hid_p, h2_p), lambda i: (0, 0), pipeline_mode=weight_mode),     # w2
            pl.BlockSpec((1, h2_p), lambda i: (0, 0), pipeline_mode=weight_mode),         # b2
            pl.BlockSpec((h2_p, out_cols), lambda i: (0, 0), pipeline_mode=weight_mode),  # w3
            pl.BlockSpec((1, out_cols), lambda i: (0, 0), pipeline_mode=weight_mode),     # b3
        ],
        out_specs=pl.BlockSpec((tile_b, out_cols), lambda i: (i, 0)),
        compiler_params=pltpu.CompilerParams(
            dimension_semantics=("parallel",),
            vmem_limit_bytes=int(vmem_limit),
        ),
    )(
        xp,
        prepared["w1"], prepared["b1"],
        prepared["w2"], prepared["b2"],
        prepared["w3"], prepared["b3"],
    )

    return out_padded[:B, :out_dim]


# ----------------------------------------------------------------------------
# Init + reference
# ----------------------------------------------------------------------------
def init_params(key, input_dim, n_samples, output_dim=1):
    """Deterministic init matching proxyNN's layer shapes.

    hidden_dim = int(n_samples * 0.5); fc1: input_dim->hidden, fc2: hidden->hidden//2,
    fc3: hidden//2 -> output_dim. PyTorch-Linear-style uniform(-1/sqrt(fan_in), +).
    Weights stored as (in, out) (transpose of PyTorch's (out, in)); biases as (1, out).
    """
    hidden_dim = int(n_samples * 0.5)
    h2 = hidden_dim // 2

    dims = [(input_dim, hidden_dim), (hidden_dim, h2), (h2, output_dim)]
    keys = jax.random.split(key, 6)
    params = {}
    for i, (fan_in, fan_out) in enumerate(dims, start=1):
        bound = 1.0 / jnp.sqrt(jnp.float32(fan_in))
        params[f"w{i}"] = jax.random.uniform(
            keys[2 * (i - 1)], (fan_in, fan_out), jnp.float32, -bound, bound
        )
        params[f"b{i}"] = jax.random.uniform(
            keys[2 * (i - 1) + 1], (1, fan_out), jnp.float32, -bound, bound
        )
    return params


def proxy_nn_reference(x, params, *, bf16_inputs=False):
    """Plain-JAX reference. bf16_inputs=True mirrors the kernel's MXU input dtype."""
    cast = (lambda a: a.astype(jnp.bfloat16)) if bf16_inputs else (lambda a: a)
    h1 = jnp.tanh(
        jnp.dot(cast(x), cast(params["w1"]), preferred_element_type=jnp.float32) + params["b1"]
    )
    h2 = jnp.tanh(
        jnp.dot(cast(h1), cast(params["w2"]), preferred_element_type=jnp.float32) + params["b2"]
    )
    return jnp.dot(cast(h2), cast(params["w3"]), preferred_element_type=jnp.float32) + params["b3"]


if __name__ == "__main__":
    key = jax.random.PRNGKey(0)
    k_x, k_p = jax.random.split(key)

    # Small, module-consistent shapes:
    #   input_dim=16, n_samples=64 -> hidden_dim=32, hidden//2=16, output_dim=1
    # batch=20 exercises the grid (auto tile -> 2 steps) and batch padding; the
    # small hidden picks the narrow (non-lane-padded) output store path.
    batch = 20
    input_dim = 16
    n_samples = 64
    output_dim = 1

    x = jax.random.normal(k_x, (batch, input_dim), jnp.float32)
    params = init_params(k_p, input_dim, n_samples, output_dim)

    prepared = prepare_params(params)          # one-time pad + bf16 cast
    out = proxy_nn_forward(x, prepared)
    out = jax.block_until_ready(out)

    assert out.shape == (batch, output_dim), out.shape

    ref_bf16 = proxy_nn_reference(x, params, bf16_inputs=True)   # matches kernel math
    ref_f32 = proxy_nn_reference(x, params, bf16_inputs=False)   # full-precision sanity
    assert jnp.allclose(out, ref_bf16, atol=5e-3, rtol=5e-3), "mismatch vs bf16-matched reference"
    assert jnp.allclose(out, ref_f32, atol=5e-2, rtol=5e-2), "mismatch vs f32 reference"

    print("KERNEL_OK")
</pallas_src>

<mosaic_0001>
module attributes {stable_mosaic.version = 11 : i64} {
  func.func @proxy_nn_kernel(%arg0: i32, %arg1: memref<16x16xf32, #tpu.memory_space<vmem>>, %arg2: memref<16x128xbf16, #tpu.memory_space<vmem>>, %arg3: memref<1x128xf32, #tpu.memory_space<vmem>>, %arg4: memref<128x128xbf16, #tpu.memory_space<vmem>>, %arg5: memref<1x128xf32, #tpu.memory_space<vmem>>, %arg6: memref<128x1xbf16, #tpu.memory_space<vmem>>, %arg7: memref<1x1xf32, #tpu.memory_space<vmem>>, %arg8: memref<16x1xf32, #tpu.memory_space<vmem>>) attributes {dimension_semantics = [#tpu.dimension_semantics<parallel>], iteration_bounds = array<i64: 2>, scalar_prefetch = 0 : i64, scratch_operands = 0 : i64, tpu.core_type = #tpu.core_type<tc>, window_params = [{transform_indices = @transform_0, window_bounds = array<i64: 16, 16>}, {pipeline_mode = #tpu.pipeline_mode<synchronous>, transform_indices = @transform_1, window_bounds = array<i64: 16, 128>}, {pipeline_mode = #tpu.pipeline_mode<synchronous>, transform_indices = @transform_2, window_bounds = array<i64: 1, 128>}, {pipeline_mode = #tpu.pipeline_mode<synchronous>, transform_indices = @transform_3, window_bounds = array<i64: 128, 128>}, {pipeline_mode = #tpu.pipeline_mode<synchronous>, transform_indices = @transform_4, window_bounds = array<i64: 1, 128>}, {pipeline_mode = #tpu.pipeline_mode<synchronous>, transform_indices = @transform_5, window_bounds = array<i64: 128, 1>}, {pipeline_mode = #tpu.pipeline_mode<synchronous>, transform_indices = @transform_6, window_bounds = array<i64: 1, 1>}, {transform_indices = @transform_7, window_bounds = array<i64: 16, 1>}]} {
    %c0 = arith.constant 0 : index
    %c0_0 = arith.constant 0 : index
    %0 = vector.load %arg1[%c0, %c0_0] : memref<16x16xf32, #tpu.memory_space<vmem>>, vector<16x16xf32>
    %1 = arith.truncf %0 : vector<16x16xf32> to vector<16x16xbf16>
    %c0_1 = arith.constant 0 : index
    %c0_2 = arith.constant 0 : index
    %2 = vector.load %arg2[%c0_1, %c0_2] : memref<16x128xbf16, #tpu.memory_space<vmem>>, vector<16x128xbf16>
    %cst = arith.constant dense<0.000000e+00> : vector<16x128xf32>
    %3 = tpu.matmul %1, %2, %cst {dimension_numbers = #tpu.dot_dimension_numbers<[1], [0], [0], [1], [0, 0, 1, 1], [], []>} : vector<16x16xbf16>, vector<16x128xbf16>, vector<16x128xf32> -> vector<16x128xf32>
    %c0_3 = arith.constant 0 : index
    %c0_4 = arith.constant 0 : index
    %4 = vector.load %arg3[%c0_3, %c0_4] : memref<1x128xf32, #tpu.memory_space<vmem>>, vector<1x128xf32>
    %5 = vector.broadcast %4 : vector<1x128xf32> to vector<16x128xf32>
    %6 = arith.addf %3, %5 : vector<16x128xf32>
    %7 = math.tanh %6 : vector<16x128xf32>
    %8 = arith.truncf %7 : vector<16x128xf32> to vector<16x128xbf16>
    %c0_5 = arith.constant 0 : index
    %c0_6 = arith.constant 0 : index
    %9 = vector.load %arg4[%c0_5, %c0_6] : memref<128x128xbf16, #tpu.memory_space<vmem>>, vector<128x128xbf16>
    %cst_7 = arith.constant dense<0.000000e+00> : vector<16x128xf32>
    %10 = tpu.matmul %8, %9, %cst_7 {dimension_numbers = #tpu.dot_dimension_numbers<[1], [0], [0], [1], [0, 0, 1, 1], [], []>} : vector<16x128xbf16>, vector<128x128xbf16>, vector<16x128xf32> -> vector<16x128xf32>
    %c0_8 = arith.constant 0 : index
    %c0_9 = arith.constant 0 : index
    %11 = vector.load %arg5[%c0_8, %c0_9] : memref<1x128xf32, #tpu.memory_space<vmem>>, vector<1x128xf32>
    %12 = vector.broadcast %11 : vector<1x128xf32> to vector<16x128xf32>
    %13 = arith.addf %10, %12 : vector<16x128xf32>
    %14 = math.tanh %13 : vector<16x128xf32>
    %15 = arith.truncf %14 : vector<16x128xf32> to vector<16x128xbf16>
    %c0_10 = arith.constant 0 : index
    %c0_11 = arith.constant 0 : index
    %16 = vector.load %arg6[%c0_10, %c0_11] : memref<128x1xbf16, #tpu.memory_space<vmem>>, vector<128x1xbf16>
    %cst_12 = arith.constant dense<0.000000e+00> : vector<16x1xf32>
    %17 = tpu.matmul %15, %16, %cst_12 {dimension_numbers = #tpu.dot_dimension_numbers<[1], [0], [0], [1], [0, 0, 1, 1], [], []>} : vector<16x128xbf16>, vector<128x1xbf16>, vector<16x1xf32> -> vector<16x1xf32>
    %c0_13 = arith.constant 0 : index
    %c0_14 = arith.constant 0 : index
    %18 = vector.load %arg7[%c0_13, %c0_14] : memref<1x1xf32, #tpu.memory_space<vmem>>, vector<1x1xf32>
    %19 = vector.broadcast %18 : vector<1x1xf32> to vector<16x1xf32>
    %20 = arith.addf %17, %19 : vector<16x1xf32>
    %c0_15 = arith.constant 0 : index
    %c0_16 = arith.constant 0 : index
    %21 = vector.load %arg8[%c0_15, %c0_16] : memref<16x1xf32, #tpu.memory_space<vmem>>, vector<16x1xf32>
    tpu.vector_store %arg8[%c0_15, %c0_16], %20 {strides = array<i32>} : memref<16x1xf32, #tpu.memory_space<vmem>>, vector<16x1xf32>,
    return
  }
  func.func @transform_0(%arg0: i32) -> (i32, i32) {
    %c0_i32 = arith.constant 0 : i32
    %c0_i32_0 = arith.constant 0 : i32
    return %arg0, %c0_i32 : i32, i32
  }
  func.func @transform_1(%arg0: i32) -> (i32, i32) {
    %c0_i32 = arith.constant 0 : i32
    %c0_i32_0 = arith.constant 0 : i32
    %c0_i32_1 = arith.constant 0 : i32
    return %c0_i32, %c0_i32_0 : i32, i32
  }
  func.func @transform_2(%arg0: i32) -> (i32, i32) {
    %c0_i32 = arith.constant 0 : i32
    %c0_i32_0 = arith.constant 0 : i32
    %c0_i32_1 = arith.constant 0 : i32
    return %c0_i32, %c0_i32_0 : i32, i32
  }
  func.func @transform_3(%arg0: i32) -> (i32, i32) {
    %c0_i32 = arith.constant 0 : i32
    %c0_i32_0 = arith.constant 0 : i32
    %c0_i32_1 = arith.constant 0 : i32
    return %c0_i32, %c0_i32_0 : i32, i32
  }
  func.func @transform_4(%arg0: i32) -> (i32, i32) {
    %c0_i32 = arith.constant 0 : i32
    %c0_i32_0 = arith.constant 0 : i32
    %c0_i32_1 = arith.constant 0 : i32
    return %c0_i32, %c0_i32_0 : i32, i32
  }
  func.func @transform_5(%arg0: i32) -> (i32, i32) {
    %c0_i32 = arith.constant 0 : i32
    %c0_i32_0 = arith.constant 0 : i32
    %c0_i32_1 = arith.constant 0 : i32
    return %c0_i32, %c0_i32_0 : i32, i32
  }
  func.func @transform_6(%arg0: i32) -> (i32, i32) {
    %c0_i32 = arith.constant 0 : i32
    %c0_i32_0 = arith.constant 0 : i32
    %c0_i32_1 = arith.constant 0 : i32
    return %c0_i32, %c0_i32_0 : i32, i32
  }
  func.func @transform_7(%arg0: i32) -> (i32, i32) {
    %c0_i32 = arith.constant 0 : i32
    %c0_i32_0 = arith.constant 0 : i32
    return %arg0, %c0_i32 : i32, i32
  }
}

</mosaic_0001>

<bundles_post_ra>
// kernel: tpu_custom_call.1
= control target key start
LH: loop header
LB: loop body
LE: loop exit
PB: predicated region body
PF: predicated region fallthrough
CT: control target
= control target key end

     0   :  { %s823_s26 = smov 0   ;;  %s927_s0 = inlined_call_operand.vmem [shape: f32[32,16], index: 0, kind: input, shape index: {}]   ;;  %s928_s1 = inlined_call_operand.vmem [shape: bf16[16,128], index: 1, kind: input, shape index: {}]   ;;  %s929_s2 = inlined_call_operand.vmem [shape: f32[1,128], index: 2, kind: input, shape index: {}]   ;;  %s930_s3 = inlined_call_operand.vmem [shape: bf16[128,128], index: 3, kind: input, shape index: {}]   ;;  %s931_s4 = inlined_call_operand.vmem [shape: f32[1,128], index: 4, kind: input, shape index: {}]   ;;  %s932_s5 = inlined_call_operand.vmem [shape: bf16[128,1], index: 5, kind: input, shape index: {}]   ;;  %s933_s6 = inlined_call_operand.<no memory space> [shape: f32[1,1], index: 6, kind: input, shape index: {}]   ;;  %s934_s7 = inlined_call_operand.vmem [shape: f32[32,1], index: 7, kind: output, shape index: {}]  }
   0x1   :  { %v12_v0 = vstv %s933_s6 }
   0x2   :  { %13 = vst [vmem:[#allocation2] sm:$0x1] %v12_v0 }
   0x3 LB: > { %s637_s27 = sadd.s32 4294967295, %s776_s26   ;;  %p641_p0 = scmp.ge.s32.totalorder %s776_s26, 1  ;;  %s776_s26 = sphi %s823_s26, %s19_s26  }
   0x4   : > { %p240_p1 = scmp.lt.s32.totalorder %s776_s26, 3 }
   0x6   : > { %p241_p2 = pnand %p641_p0, %p240_p1 }
   0x7   : > { %v745_v1 = vld [vmem:[%s928_s1] sm:$0xff] (!%p241_p2)   ;;  %v778_v2 = vmov (!%p241_p2), 0.0   ;;  %s642_s6 = sshll.u32 (!%p241_p2), %s637_s27, 1  ;;  %vm779_vm0 = vmmov (!%p241_p2), 0   ;;  %v747_v4 = vld [vmem:[%s930_s3 + $0x8] sm:$0xff] (!%p241_p2)   ;;  %v748_v5 = vld [vmem:[%s930_s3 + $0x10] sm:$0xff] (!%p241_p2)  }
   0x8   : > { %244 = sbr.rel (%p241_p2) target bundleno = 696 (0x2b8), region = 48  ;;  %689 = vmatprep.subr.bf16.mxu0 (!%p241_p2), %v778_v2  ;;  %695 = vmatprep.subr.bf16.mxu1 (!%p241_p2), %v778_v2  ;;  %v746_v3 = vld [vmem:[%s930_s3] sm:$0xff] (!%p241_p2)   ;;  %p273_p3 = scmp.lt.s32.totalorder (!%p241_p2), %s642_s6, 3  ;;  %vm303_vm1 = vcmask (!%p241_p2), 130048   ;;  %v749_v9 = vld [vmem:[%s930_s3 + $0x18] sm:$0xff] (!%p241_p2)   ;;  %v751_v11 = vld [vmem:[%s930_s3 + $0x28] sm:$0xff] (!%p241_p2)  }
   0x9   : > { %690 = vmatpush3.bf16.msra.mxu0 (!%p241_p2), %v745_v1  ;;  %691 = vmatprep.mubr.msk.bf16.mxu0 (!%p241_p2), %vm779_vm0, %v778_v2  ;;  %v750_v10 = vld [vmem:[%s930_s3 + $0x20] sm:$0xff] (!%p241_p2)   ;;  %v752_v12 = vld [vmem:[%s930_s3 + $0x30] sm:$0xff] (!%p241_p2)   ;;  %v753_v13 = vld [vmem:[%s930_s3 + $0x38] sm:$0xff] (!%p241_p2)   ;;  %vm578_vm2 = vcmask (!%p241_p2), 7168  }
   0xa   : > { %696 = vmatpush3.bf16.msra.mxu1 (!%p241_p2), %v746_v3  ;;  %711 = vmatprep.mubr.msk.bf16.mxu1 (!%p241_p2), %vm779_vm0, %v778_v2  ;;  %v754_v14 = vld [vmem:[%s932_s5] sm:$0xff] (!%p241_p2)   ;;  %v755_v15 = vld [vmem:[%s932_s5 + $0x8] sm:$0xff] (!%p241_p2)   ;;  %v756_v16 = vld [vmem:[%s932_s5 + $0x10] sm:$0xff] (!%p241_p2)  }
   0xb   : > { %697 = vmatprep.subr.bf16.mxu1 (!%p241_p2), %v778_v2  ;;  %715 = vmatprep.subr.bf16.mxu0 (!%p241_p2), %v778_v2  ;;  %v757_v17 = vld [vmem:[%s932_s5 + $0x18] sm:$0xff] (!%p241_p2)   ;;  %v646_v18 = vld [vmem:[%s929_s2] ss:$0 sm:$0xff] (!%p241_p2)  ;;  %v759_v29 = vld [vmem:[%s932_s5 + $0x28] sm:$0xff] (!%p241_p2)  }
   0xc   : > { %v758_v28 = vld [vmem:[%s932_s5 + $0x20] sm:$0xff] (!%p241_p2)   ;;  %v760_v30 = vld [vmem:[%s932_s5 + $0x30] sm:$0xff] (!%p241_p2)   ;;  %v761_v31 = vld [vmem:[%s932_s5 + $0x38] sm:$0xff] (!%p241_p2)  }
   0xd   : > { %v649_v32 = vld [vmem:[%s931_s4] ss:$0 sm:$0xff] (!%p241_p2) }
   0xe   : > { %698 = vmatpush3.bf16.msra.mxu1 (!%p241_p2), %v747_v4  ;;  %v658_v42 = vld [vmem:[#allocation2] ss:$0 sm:$0xff] (!%p241_p2) }
   0xf   : > { %s936_s6 = smov (!%p273_p3, %s642_s6), 3  ;;  %699 = vmatprep.subr.bf16.mxu1 %v778_v2 }
  0x10   : > { %s643_s11 = sshll.u32 %s936_s6, 3 }
  0x11   : > { %s276_s16 = scalar_lea.vmem %s927_s0, %s643_s11  ;;  %s282_s29 = scalar_lea.vmem %s934_s7, %s643_s11 }
  0x12   : > { %v285_v6 = vld [vmem:[%s276_s16] sm:$0xff]  ;;  %v286_v7 = vld [vmem:[%s276_s16 + $0x8] sm:$0xff]  ;;  %700 = vmatpush3.bf16.msra.mxu1 %v748_v5 }
  0x13   : > { %v287_v8 = vpack.c.bf16 %v286_v7, %v285_v6  ;;  %701 = vmatprep.subr.bf16.mxu1 %v778_v2 }
  0x15   : > { %692 = vmatmul.mubr.msk.bf16.vlgmr.msra.gmra.mrb[0].mxu0 %vm303_vm1, %v287_v8 }
  0x16   : > { %731 = vmatprep.mubr.msk.bf16.mxu0 %vm779_vm0, %v778_v2  ;;  %702 = vmatpush3.bf16.msra.mxu1 %v749_v9 }
  0x17   : > { %703 = vmatprep.subr.bf16.mxu1 %v778_v2  ;;  %716 = vmatpush3.bf16.msra.mxu0 %v754_v14 }
  0x18   : > { %717 = vmatprep.subr.bf16.mxu0 %v778_v2 }
  0x1a   : > { %704 = vmatpush3.bf16.msra.mxu1 %v750_v10 }
  0x1b   : > { %705 = vmatprep.subr.bf16.mxu1 %v778_v2  ;;  %718 = vmatpush3.bf16.msra.mxu0 %v755_v15 }
  0x1c   : > { %719 = vmatprep.subr.bf16.mxu0 %v778_v2 }
  0x1e   : > { %706 = vmatpush3.bf16.msra.mxu1 %v751_v11 }
  0x1f   : > { %707 = vmatprep.subr.bf16.mxu1 %v778_v2  ;;  %720 = vmatpush3.bf16.msra.mxu0 %v756_v16 }
  0x20   : > { %721 = vmatprep.subr.bf16.mxu0 %v778_v2 }
  0x22   : > { %708 = vmatpush3.bf16.msra.mxu1 %v752_v12 }
  0x23   : > { %709 = vmatprep.subr.bf16.mxu1 %v778_v2  ;;  %722 = vmatpush3.bf16.msra.mxu0 %v757_v17 }
  0x24   : > { %723 = vmatprep.subr.bf16.mxu0 %v778_v2 }
  0x26   : > { %710 = vmatpush3.bf16.msra.mxu1 %v753_v13 }
  0x27   : > { %724 = vmatpush3.bf16.msra.mxu0 %v758_v28 }
  0x28   : > { %725 = vmatprep.subr.bf16.mxu0 %v778_v2 }
  0x2b   : > { %726 = vmatpush3.bf16.msra.mxu0 %v759_v29 }
  0x2c   : > { %727 = vmatprep.subr.bf16.mxu0 %v778_v2 }
  0x2f   : > { %728 = vmatpush3.bf16.msra.mxu0 %v760_v30 }
  0x30   : > { %729 = vmatprep.subr.bf16.mxu0 %v778_v2 }
  0x33   : > { %730 = vmatpush3.bf16.msra.mxu0 %v761_v31 }
  0xe8   : > { %v341_v19 = vpop.f32.mrb[0].mxu0 }
  0xe9   : > { %v342_v20 = vadd.f32 %v646_v18, %v341_v19  ;;  %v693_v21 = vpop.f32.mrb[1].mxu0 }
  0xea   : > { %v344_v22 = vpop.f32.mrb[2].mxu0 }
  0xeb   : > { %v345_v23 = vadd.f32 %v646_v18, %v344_v22  ;;  %v694_v24 = vpop.f32.mrb[3].mxu0  ;;  %762 = vtanh.f32 %v342_v20 }
  0xed   : > { %764 = vtanh.f32 %v345_v23 }
  0xf5   : > { %v763_v25 = vpop.eup %762 }
  0xf7   : > { %v765_v26 = vpop.eup %764 }
  0xf8   : > { %v350_v27 = vpack.c.bf16 %v765_v26, %v763_v25 }
  0xfa   : > { %712 = vmatmul.mubr.bf16.vlgmr.msra.gmra.mrb[0].mxu1 %v350_v27 }
 0x1cd   : > { %v456_v33 = vpop.f32.mrb[0].mxu1 }
 0x1ce   : > { %v457_v34 = vadd.f32 %v649_v32, %v456_v33  ;;  %v713_v35 = vpop.f32.mrb[1].mxu1 }
 0x1cf   : > { %v459_v36 = vpop.f32.mrb[2].mxu1 }
 0x1d0   : > { %v460_v37 = vadd.f32 %v649_v32, %v459_v36  ;;  %v714_v38 = vpop.f32.mrb[3].mxu1  ;;  %766 = vtanh.f32 %v457_v34 }
 0x1d2   : > { %768 = vtanh.f32 %v460_v37 }
 0x1da   : > { %v767_v39 = vpop.eup %766 }
 0x1dc   : > { %v769_v40 = vpop.eup %768 }
 0x1dd   : > { %v465_v41 = vpack.c.bf16 %v769_v40, %v767_v39 }
 0x1df   : > { %732 = vmatmul.mubr.bf16.vlgmr.msra.gmra.mrb[4].mxu0 %v465_v41 }
 0x2b2   : > { %v571_v43 = vpop.f32.mrb[4].mxu0 }
 0x2b3   : > { %v572_v44 = vadd.f32 %v658_v42, %v571_v43  ;;  %v733_v45 = vpop.f32.mrb[5].mxu0 }
 0x2b4   : > { %v574_v46 = vpop.f32.mrb[6].mxu0 }
 0x2b5   : > { %579 = vst.msk [vmem:[%s282_s29] sm:$0xff] %vm578_vm2, %v572_v44  ;;  %v575_v47 = vadd.f32 %v658_v42, %v574_v46  ;;  %v734_v48 = vpop.f32.mrb[7].mxu0 }
 0x2b7   : > { %580 = vst.msk [vmem:[%s282_s29 + $0x8] sm:$0xff] %vm578_vm2, %v575_v47 }
 0x2b8 PF: > { %s19_s26 = sadd.s32 1, %s776_s26  }
 0x2b9   : > { %p16_p4 = scmp.ge.s32.totalorder %s19_s26, 4  }
 0x2bb   :  { %18 = sbr.rel (!%p16_p4) target bundleno = 3 (0x3), region = 78 }

</bundles_post_ra>
